<compile_context>
chip_gen: v6e
topology: v6e:2x2x1
jax: 0.10.0
libtpu: 0.0.40
codegen_flags: <defaults>
</compile_context>

<pallas_src>
import functools

import jax
import jax.numpy as jnp
from jax import lax
from jax.experimental import pallas as pl
from jax.experimental.pallas import tpu as pltpu

THRESHOLD = 1.0 - 0.1  # same as the PyTorch module


def _act_kernel(state_ref, time_ref, pos_ref, wp_ref, bp_ref, wfn_ref, bfn_ref,
                prev_ref, rem_ref, nup_ref, *, max_hop, unroll):
    tl, h = state_ref.shape

    # Loaded once, reused by every hop.  The (1, H) rows are used directly —
    # a (1, H) operand sublane-broadcasts essentially for free on the VPU, so
    # no (tile_l, H) copies compete with the matmul operands for vregs/VMEM
    # across the unrolled iterations.
    time_b = time_ref[...]                                   # (tl, h) f32
    wfn_bf = wfn_ref[...]                                    # (h, h) bf16
    wp_row = wp_ref[...]                                     # (1, h) f32
    bp_sc = bp_ref[...]                                      # (1, 1) f32
    bfn_row = bfn_ref[...]                                   # (1, h) f32

    zcol = jnp.zeros((tl, 1), jnp.float32)
    init = (state_ref[...],                                  # running state
            zcol,                                            # halting prob
            zcol,                                            # remainders
            zcol,                                            # n_updates
            jnp.zeros((tl, h), jnp.float32))                 # previous_state

    def body(step, carry):
        st, hp, rem, nup, prev = carry
        # state = state + time_enc + pos_enc[:, step, :]
        st = st + time_b + pos_ref[pl.ds(step, 1), :]

        # p = sigmoid(Linear_{H->1}(state)) on VPU (mul) + XLU (lane reduce)
        # + EUP (sigmoid); keeps the MXU free for the HxH transition matmul.
        p = jax.nn.sigmoid(jnp.sum(st * wp_row, axis=-1, keepdims=True) + bp_sc)

        # Halting bookkeeping -- all in f32 so threshold decisions are exact.
        still = (hp < 1.0).astype(jnp.float32)
        cand = hp + p * still
        new_halted = (cand > THRESHOLD).astype(jnp.float32) * still
        still = (cand <= THRESHOLD).astype(jnp.float32) * still
        hp = hp + p * still
        rem = rem + new_halted * (1.0 - hp)
        hp = hp + new_halted * rem
        nup = nup + still + new_halted
        uw = p * still + new_halted * rem                    # (tl, 1)

        # state = fn(state): stand-in transition tanh(st @ Wfn + bfn).
        # bf16 operands on the MXU, f32 accumulation.
        # TODO(synk): keep st in f32 (weights-only downcast) if bit-faithful
        # halting decisions near THRESHOLD are required.
        new_st = jnp.tanh(
            jnp.dot(st.astype(jnp.bfloat16), wfn_bf,
                    preferred_element_type=jnp.float32) + bfn_row)

        # previous_state = state*w + previous_state*(1-w)
        prev = new_st * uw + prev * (1.0 - uw)
        return new_st, hp, rem, nup, prev

    # Hops are serially dependent, so unrolling only removes loop overhead:
    # fully unroll small max_hop, otherwise unroll=2 to bound live ranges.
    _st, _hp, rem, nup, prev = lax.fori_loop(0, max_hop, body, init,
                                             unroll=unroll)

    # Single store per output per tile (no per-hop masked partial stores).
    prev_ref[...] = prev
    rem_ref[...] = rem
    nup_ref[...] = nup


def _physical_vmem_bytes():
    """Physical VMEM per TensorCore; conservative 64 MiB (v7x) fallback."""
    try:
        return int(pltpu.get_tpu_info().vmem_capacity_bytes)
    except Exception:
        return 64 * 1024 * 1024


def _resident_vmem_bytes(tile_l, H, max_hop):
    """Estimated resident VMEM for one grid step at a given row-tile size."""
    f32, bf16 = 4, 2
    b = 3 * 2 * tile_l * H * f32                 # state/time in + prev out, double-buffered
    b += 2 * 2 * tile_l * 1 * f32                # rem / nup out blocks
    b += 2 * (H * H * bf16                       # wfn (still double-buffered)
              + max_hop * H * f32                # pos_enc
              + 2 * H * f32 + f32)               # wp, bfn, bp
    b += 6 * tile_l * H * f32                    # live hop-body temporaries (est.)
    return b


def _choose_tile_l(L, H, max_hop, budget_bytes):
    """Largest MXU-friendly divisor of L whose resident set fits the budget."""
    divs = [d for d in range(8, L + 1, 8) if L % d == 0]
    if L not in divs:
        divs.append(L)  # whole-L fallback (block == full dim is always legal)

    def fits(d):
        return _resident_vmem_bytes(d, H, max_hop) <= budget_bytes

    for align in (256, 128, 16, 8):
        cands = [d for d in divs if d % align == 0 and fits(d)]
        if cands:
            return max(cands)
    fitting = [d for d in divs if fits(d)]
    return max(fitting) if fitting else min(divs)


def act_basic_pallas(state, time_enc, pos_enc, wp, bp, wfn, bfn, max_hop):
    """state: (B, L, H); time_enc: (1, >=L, H); pos_enc: (1, >=max_hop, H)."""
    B, L, H = state.shape

    phys_vmem = _physical_vmem_bytes()
    budget = int(phys_vmem * 0.60)               # headroom for compiler scratch
    tile_l = _choose_tile_l(L, H, max_hop, budget)
    n_lt = L // tile_l
    vmem_limit = int(min(phys_vmem * 0.85, phys_vmem - (4 << 20)))
    vmem_limit = max(vmem_limit, 32 << 20)

    st = state.astype(jnp.float32)                            # (B, L, H)
    time2 = time_enc[0, :L, :].astype(jnp.float32)            # (L, H), no B bcast
    pos2 = pos_enc[0, :max_hop, :].astype(jnp.float32)        # (max_hop, H)
    wp_row = jnp.reshape(wp, (1, H)).astype(jnp.float32)      # (1, H)
    bp2 = jnp.reshape(bp, (1, 1)).astype(jnp.float32)         # (1, 1)
    wfn_bf = wfn.astype(jnp.bfloat16)                         # (H, H) bf16 weights
    bfn2 = jnp.reshape(bfn, (1, H)).astype(jnp.float32)       # (1, H)

    unroll = max_hop if max_hop <= 4 else 2
    kernel = functools.partial(_act_kernel, max_hop=max_hop, unroll=unroll)

    # Batch innermost when there are multiple L tiles so the time_enc block
    # (index depends only on l) stays resident across all inner B steps.
    if n_lt > 1:
        grid = (n_lt, B)
        def row3(l, b): return (b, l, 0)
        def row2(l, b): return (l, 0)
        def const(l, b): return (0, 0)
    else:
        grid = (B, n_lt)
        def row3(b, l): return (b, l, 0)
        def row2(b, l): return (l, 0)
        def const(b, l): return (0, 0)

    flops = 2 * max_hop * B * L * H * H + 16 * max_hop * B * L * H
    transcendentals = max_hop * B * L * (H + 1)               # tanh + sigmoid
    bytes_accessed = ((B * L * H + L * H + max_hop * H + 3 * H + 1) * 4
                      + H * H * 2
                      + (B * L * H + 2 * B * L) * 4)

    prev, rem, nup = pl.pallas_call(
        kernel,
        out_shape=(
            jax.ShapeDtypeStruct((B, L, H), jnp.float32),   # previous_state
            jax.ShapeDtypeStruct((B, L, 1), jnp.float32),   # remainders
            jax.ShapeDtypeStruct((B, L, 1), jnp.float32),   # n_updates
        ),
        grid_spec=pltpu.PrefetchScalarGridSpec(
            num_scalar_prefetch=0,
            grid=grid,
            in_specs=[
                pl.BlockSpec((None, tile_l, H), row3),      # state
                pl.BlockSpec((tile_l, H), row2),            # time_enc
                pl.BlockSpec((max_hop, H), const),          # pos_enc
                pl.BlockSpec((1, H), const),                # wp row
                pl.BlockSpec((1, 1), const),                # bp
                pl.BlockSpec((H, H), const),                # wfn bf16
                pl.BlockSpec((1, H), const),                # bfn
            ],
            out_specs=(
                pl.BlockSpec((None, tile_l, H), row3),
                pl.BlockSpec((None, tile_l, 1), row3),
                pl.BlockSpec((None, tile_l, 1), row3),
            ),
        ),
        compiler_params=pltpu.CompilerParams(
            dimension_semantics=("parallel", "parallel"),
            vmem_limit_bytes=vmem_limit),
        cost_estimate=pl.CostEstimate(
            flops=int(flops),
            transcendentals=int(transcendentals),
            bytes_accessed=int(bytes_accessed)),
    )(st, time2, pos2, wp_row, bp2, wfn_bf, bfn2)

    return prev, rem[..., 0], nup[..., 0]


def act_basic_ref(state, time_enc, pos_enc, wp, bp, wfn, bfn, max_hop):
    """Pure-JAX reference mirroring the PyTorch forward (non-decoding path)."""
    B, L, H = state.shape
    hp = jnp.zeros((B, L), jnp.float32)
    rem = jnp.zeros((B, L), jnp.float32)
    nup = jnp.zeros((B, L), jnp.float32)
    prev = jnp.zeros_like(state)
    st = state
    for step in range(max_hop):
        st = st + time_enc[:, :L, :]
        st = st + pos_enc[:, step, :][:, None, :]
        p = jax.nn.sigmoid(st @ wp + bp)[..., 0]
        sr = (hp < 1.0).astype(jnp.float32)
        cand = hp + p * sr
        new_halted = (cand > THRESHOLD).astype(jnp.float32) * sr
        sr = (cand <= THRESHOLD).astype(jnp.float32) * sr
        hp = hp + p * sr
        rem = rem + new_halted * (1.0 - hp)
        hp = hp + new_halted * rem
        nup = nup + sr + new_halted
        uw = p * sr + new_halted * rem
        st = jnp.tanh(st @ wfn + bfn)
        prev = st * uw[..., None] + prev * (1.0 - uw[..., None])
    return prev, rem, nup


if __name__ == "__main__":
    B, L, H = 2, 8, 32
    MAX_HOP = 4

    key = jax.random.PRNGKey(0)
    ks = jax.random.split(key, 6)
    state = jax.random.normal(ks[0], (B, L, H), jnp.float32) * 0.5
    time_enc = jax.random.normal(ks[1], (1, L, H), jnp.float32) * 0.1
    pos_enc = jax.random.normal(ks[2], (1, MAX_HOP, H), jnp.float32) * 0.1

    # Parameters of self.p = nn.Linear(hidden_size, 1); bias filled with 1.0.
    wp = jax.random.normal(ks[3], (H, 1), jnp.float32) * 0.05
    bp = jnp.ones((1,), jnp.float32)
    # Stand-in transition fn parameters.
    wfn = jax.random.normal(ks[4], (H, H), jnp.float32) * 0.1
    bfn = jax.random.normal(ks[5], (H,), jnp.float32) * 0.1

    prev, rem, nup = act_basic_pallas(
        state, time_enc, pos_enc, wp, bp, wfn, bfn, MAX_HOP)
    jax.block_until_ready((prev, rem, nup))

    r_prev, r_rem, r_nup = act_basic_ref(
        state, time_enc, pos_enc, wp, bp, wfn, bfn, MAX_HOP)
    assert prev.shape == (B, L, H) and rem.shape == (B, L) and nup.shape == (B, L)
    # bf16 MXU operands (f32 accumulation) in the kernel => slightly looser tol.
    assert float(jnp.max(jnp.abs(prev - r_prev))) < 2e-2
    assert float(jnp.max(jnp.abs(rem - r_rem))) < 2e-2
    assert float(jnp.max(jnp.abs(nup - r_nup))) < 2e-2

    print("KERNEL_OK")
</pallas_src>

<mosaic_0001>
module attributes {stable_mosaic.version = 11 : i64} {
  func.func @_act_kernel(%arg0: i32, %arg1: i32, %arg2: memref<1x8x32xf32, #tpu.memory_space<vmem>>, %arg3: memref<8x32xf32, #tpu.memory_space<vmem>>, %arg4: memref<4x32xf32, #tpu.memory_space<vmem>>, %arg5: memref<1x32xf32, #tpu.memory_space<vmem>>, %arg6: memref<1x1xf32, #tpu.memory_space<vmem>>, %arg7: memref<32x32xbf16, #tpu.memory_space<vmem>>, %arg8: memref<1x32xf32, #tpu.memory_space<vmem>>, %arg9: memref<1x8x32xf32, #tpu.memory_space<vmem>>, %arg10: memref<1x8x1xf32, #tpu.memory_space<vmem>>, %arg11: memref<1x8x1xf32, #tpu.memory_space<vmem>>) attributes {dimension_semantics = [#tpu.dimension_semantics<parallel>, #tpu.dimension_semantics<parallel>], iteration_bounds = array<i64: 2, 1>, scalar_prefetch = 0 : i64, scratch_operands = 0 : i64, tpu.core_type = #tpu.core_type<tc>, window_params = [{transform_indices = @transform_0, window_bounds = array<i64: 1, 8, 32>}, {transform_indices = @transform_1, window_bounds = array<i64: 8, 32>}, {pipeline_mode = #tpu.pipeline_mode<synchronous>, transform_indices = @transform_2, window_bounds = array<i64: 4, 32>}, {pipeline_mode = #tpu.pipeline_mode<synchronous>, transform_indices = @transform_3, window_bounds = array<i64: 1, 32>}, {pipeline_mode = #tpu.pipeline_mode<synchronous>, transform_indices = @transform_4, window_bounds = array<i64: 1, 1>}, {pipeline_mode = #tpu.pipeline_mode<synchronous>, transform_indices = @transform_5, window_bounds = array<i64: 32, 32>}, {pipeline_mode = #tpu.pipeline_mode<synchronous>, transform_indices = @transform_6, window_bounds = array<i64: 1, 32>}, {transform_indices = @transform_7, window_bounds = array<i64: 1, 8, 32>}, {transform_indices = @transform_8, window_bounds = array<i64: 1, 8, 1>}, {transform_indices = @transform_9, window_bounds = array<i64: 1, 8, 1>}]} {
    %c0 = arith.constant 0 : index
    %c0_0 = arith.constant 0 : index
    %0 = vector.load %arg3[%c0, %c0_0] : memref<8x32xf32, #tpu.memory_space<vmem>>, vector<8x32xf32>
    %c0_1 = arith.constant 0 : index
    %c0_2 = arith.constant 0 : index
    %1 = vector.load %arg7[%c0_1, %c0_2] : memref<32x32xbf16, #tpu.memory_space<vmem>>, vector<32x32xbf16>
    %c0_3 = arith.constant 0 : index
    %c0_4 = arith.constant 0 : index
    %2 = vector.load %arg5[%c0_3, %c0_4] : memref<1x32xf32, #tpu.memory_space<vmem>>, vector<1x32xf32>
    %c0_5 = arith.constant 0 : index
    %c0_6 = arith.constant 0 : index
    %3 = vector.load %arg6[%c0_5, %c0_6] : memref<1x1xf32, #tpu.memory_space<vmem>>, vector<1x1xf32>
    %c0_7 = arith.constant 0 : index
    %c0_8 = arith.constant 0 : index
    %4 = vector.load %arg8[%c0_7, %c0_8] : memref<1x32xf32, #tpu.memory_space<vmem>>, vector<1x32xf32>
    %cst = arith.constant 0.000000e+00 : f32
    %5 = vector.broadcast %cst : f32 to vector<8x1xf32>
    %c0_9 = arith.constant 0 : index
    %c0_10 = arith.constant 0 : index
    %c0_11 = arith.constant 0 : index
    %6 = vector.load %arg2[%c0_9, %c0_10, %c0_11] : memref<1x8x32xf32, #tpu.memory_space<vmem>>, vector<1x8x32xf32>
    %7 = vector.shape_cast %6 : vector<1x8x32xf32> to vector<8x32xf32>
    %cst_12 = arith.constant 0.000000e+00 : f32
    %8 = vector.broadcast %cst_12 : f32 to vector<8x32xf32>
    %c0_i32 = arith.constant 0 : i32
    %9 = arith.addf %7, %0 : vector<8x32xf32>
    %10 = arith.index_cast %c0_i32 : i32 to index
    %c0_13 = arith.constant 0 : index
    %11 = vector.load %arg4[%10, %c0_13] : memref<4x32xf32, #tpu.memory_space<vmem>>, vector<1x32xf32>
    %12 = vector.broadcast %11 : vector<1x32xf32> to vector<8x32xf32>
    %13 = arith.addf %9, %12 : vector<8x32xf32>
    %14 = vector.broadcast %2 : vector<1x32xf32> to vector<8x32xf32>
    %15 = arith.mulf %13, %14 : vector<8x32xf32>
    %cst_14 = arith.constant dense<0.000000e+00> : vector<8xf32>
    %16 = vector.multi_reduction <add>, %15, %cst_14 [1] : vector<8x32xf32> to vector<8xf32>
    %17 = vector.shape_cast %16 : vector<8xf32> to vector<8x1xf32>
    %18 = vector.broadcast %3 : vector<1x1xf32> to vector<8x1xf32>
    %19 = arith.addf %17, %18 : vector<8x1xf32>
    %20 = arith.negf %19 : vector<8x1xf32>
    %21 = math.exp %20 : vector<8x1xf32>
    %cst_15 = arith.constant 1.000000e+00 : f32
    %22 = vector.broadcast %cst_15 : f32 to vector<8x1xf32>
    %23 = arith.addf %22, %21 : vector<8x1xf32>
    %24 = arith.divf %22, %23 : vector<8x1xf32>
    %cst_16 = arith.constant 1.000000e+00 : f32
    %25 = vector.broadcast %cst_16 : f32 to vector<8x1xf32>
    %26 = arith.cmpf olt, %5, %25 : vector<8x1xf32>
    %27 = arith.extui %26 : vector<8x1xi1> to vector<8x1xi32>
    %28 = arith.sitofp %27 : vector<8x1xi32> to vector<8x1xf32>
    %29 = arith.mulf %24, %28 : vector<8x1xf32>
    %30 = arith.addf %5, %29 : vector<8x1xf32>
    %cst_17 = arith.constant 0.899999976 : f32
    %31 = vector.broadcast %cst_17 : f32 to vector<8x1xf32>
    %32 = arith.cmpf ogt, %30, %31 : vector<8x1xf32>
    %33 = arith.extui %32 : vector<8x1xi1> to vector<8x1xi32>
    %34 = arith.sitofp %33 : vector<8x1xi32> to vector<8x1xf32>
    %35 = arith.mulf %34, %28 : vector<8x1xf32>
    %cst_18 = arith.constant 0.899999976 : f32
    %36 = vector.broadcast %cst_18 : f32 to vector<8x1xf32>
    %37 = arith.cmpf ole, %30, %36 : vector<8x1xf32>
    %38 = arith.extui %37 : vector<8x1xi1> to vector<8x1xi32>
    %39 = arith.sitofp %38 : vector<8x1xi32> to vector<8x1xf32>
    %40 = arith.mulf %39, %28 : vector<8x1xf32>
    %41 = arith.mulf %24, %40 : vector<8x1xf32>
    %42 = arith.addf %5, %41 : vector<8x1xf32>
    %cst_19 = arith.constant 1.000000e+00 : f32
    %43 = vector.broadcast %cst_19 : f32 to vector<8x1xf32>
    %44 = arith.subf %43, %42 : vector<8x1xf32>
    %45 = arith.mulf %35, %44 : vector<8x1xf32>
    %46 = arith.addf %5, %45 : vector<8x1xf32>
    %47 = arith.mulf %35, %46 : vector<8x1xf32>
    %48 = arith.addf %42, %47 : vector<8x1xf32>
    %49 = arith.addf %5, %40 : vector<8x1xf32>
    %50 = arith.addf %49, %35 : vector<8x1xf32>
    %51 = arith.mulf %24, %40 : vector<8x1xf32>
    %52 = arith.mulf %35, %46 : vector<8x1xf32>
    %53 = arith.addf %51, %52 : vector<8x1xf32>
    %54 = arith.truncf %13 : vector<8x32xf32> to vector<8x32xbf16>
    %cst_20 = arith.constant dense<0.000000e+00> : vector<8x32xf32>
    %55 = tpu.matmul %54, %1, %cst_20 {dimension_numbers = #tpu.dot_dimension_numbers<[1], [0], [0], [1], [0, 0, 1, 1], [], []>} : vector<8x32xbf16>, vector<32x32xbf16>, vector<8x32xf32> -> vector<8x32xf32>
    %56 = vector.broadcast %4 : vector<1x32xf32> to vector<8x32xf32>
    %57 = arith.addf %55, %56 : vector<8x32xf32>
    %58 = math.tanh %57 : vector<8x32xf32>
    %59 = vector.broadcast %53 : vector<8x1xf32> to vector<8x32xf32>
    %60 = arith.mulf %58, %59 : vector<8x32xf32>
    %cst_21 = arith.constant 1.000000e+00 : f32
    %61 = vector.broadcast %cst_21 : f32 to vector<8x1xf32>
    %62 = arith.subf %61, %53 : vector<8x1xf32>
    %63 = vector.broadcast %62 : vector<8x1xf32> to vector<8x32xf32>
    %64 = arith.mulf %8, %63 : vector<8x32xf32>
    %65 = arith.addf %60, %64 : vector<8x32xf32>
    %c1_i32 = arith.constant 1 : i32
    %66 = arith.addf %58, %0 : vector<8x32xf32>
    %67 = arith.index_cast %c1_i32 : i32 to index
    %c0_22 = arith.constant 0 : index
    %68 = vector.load %arg4[%67, %c0_22] : memref<4x32xf32, #tpu.memory_space<vmem>>, vector<1x32xf32>
    %69 = vector.broadcast %68 : vector<1x32xf32> to vector<8x32xf32>
    %70 = arith.addf %66, %69 : vector<8x32xf32>
    %71 = vector.broadcast %2 : vector<1x32xf32> to vector<8x32xf32>
    %72 = arith.mulf %70, %71 : vector<8x32xf32>
    %cst_23 = arith.constant dense<0.000000e+00> : vector<8xf32>
    %73 = vector.multi_reduction <add>, %72, %cst_23 [1] : vector<8x32xf32> to vector<8xf32>
    %74 = vector.shape_cast %73 : vector<8xf32> to vector<8x1xf32>
    %75 = vector.broadcast %3 : vector<1x1xf32> to vector<8x1xf32>
    %76 = arith.addf %74, %75 : vector<8x1xf32>
    %77 = arith.negf %76 : vector<8x1xf32>
    %78 = math.exp %77 : vector<8x1xf32>
    %cst_24 = arith.constant 1.000000e+00 : f32
    %79 = vector.broadcast %cst_24 : f32 to vector<8x1xf32>
    %80 = arith.addf %79, %78 : vector<8x1xf32>
    %81 = arith.divf %79, %80 : vector<8x1xf32>
    %cst_25 = arith.constant 1.000000e+00 : f32
    %82 = vector.broadcast %cst_25 : f32 to vector<8x1xf32>
    %83 = arith.cmpf olt, %48, %82 : vector<8x1xf32>
    %84 = arith.extui %83 : vector<8x1xi1> to vector<8x1xi32>
    %85 = arith.sitofp %84 : vector<8x1xi32> to vector<8x1xf32>
    %86 = arith.mulf %81, %85 : vector<8x1xf32>
    %87 = arith.addf %48, %86 : vector<8x1xf32>
    %cst_26 = arith.constant 0.899999976 : f32
    %88 = vector.broadcast %cst_26 : f32 to vector<8x1xf32>
    %89 = arith.cmpf ogt, %87, %88 : vector<8x1xf32>
    %90 = arith.extui %89 : vector<8x1xi1> to vector<8x1xi32>
    %91 = arith.sitofp %90 : vector<8x1xi32> to vector<8x1xf32>
    %92 = arith.mulf %91, %85 : vector<8x1xf32>
    %cst_27 = arith.constant 0.899999976 : f32
    %93 = vector.broadcast %cst_27 : f32 to vector<8x1xf32>
    %94 = arith.cmpf ole, %87, %93 : vector<8x1xf32>
    %95 = arith.extui %94 : vector<8x1xi1> to vector<8x1xi32>
    %96 = arith.sitofp %95 : vector<8x1xi32> to vector<8x1xf32>
    %97 = arith.mulf %96, %85 : vector<8x1xf32>
    %98 = arith.mulf %81, %97 : vector<8x1xf32>
    %99 = arith.addf %48, %98 : vector<8x1xf32>
    %cst_28 = arith.constant 1.000000e+00 : f32
    %100 = vector.broadcast %cst_28 : f32 to vector<8x1xf32>
    %101 = arith.subf %100, %99 : vector<8x1xf32>
    %102 = arith.mulf %92, %101 : vector<8x1xf32>
    %103 = arith.addf %46, %102 : vector<8x1xf32>
    %104 = arith.mulf %92, %103 : vector<8x1xf32>
    %105 = arith.addf %99, %104 : vector<8x1xf32>
    %106 = arith.addf %50, %97 : vector<8x1xf32>
    %107 = arith.addf %106, %92 : vector<8x1xf32>
    %108 = arith.mulf %81, %97 : vector<8x1xf32>
    %109 = arith.mulf %92, %103 : vector<8x1xf32>
    %110 = arith.addf %108, %109 : vector<8x1xf32>
    %111 = arith.truncf %70 : vector<8x32xf32> to vector<8x32xbf16>
    %cst_29 = arith.constant dense<0.000000e+00> : vector<8x32xf32>
    %112 = tpu.matmul %111, %1, %cst_29 {dimension_numbers = #tpu.dot_dimension_numbers<[1], [0], [0], [1], [0, 0, 1, 1], [], []>} : vector<8x32xbf16>, vector<32x32xbf16>, vector<8x32xf32> -> vector<8x32xf32>
    %113 = vector.broadcast %4 : vector<1x32xf32> to vector<8x32xf32>
    %114 = arith.addf %112, %113 : vector<8x32xf32>
    %115 = math.tanh %114 : vector<8x32xf32>
    %116 = vector.broadcast %110 : vector<8x1xf32> to vector<8x32xf32>
    %117 = arith.mulf %115, %116 : vector<8x32xf32>
    %cst_30 = arith.constant 1.000000e+00 : f32
    %118 = vector.broadcast %cst_30 : f32 to vector<8x1xf32>
    %119 = arith.subf %118, %110 : vector<8x1xf32>
    %120 = vector.broadcast %119 : vector<8x1xf32> to vector<8x32xf32>
    %121 = arith.mulf %65, %120 : vector<8x32xf32>
    %122 = arith.addf %117, %121 : vector<8x32xf32>
    %c2_i32 = arith.constant 2 : i32
    %123 = arith.addf %115, %0 : vector<8x32xf32>
    %124 = arith.index_cast %c2_i32 : i32 to index
    %c0_31 = arith.constant 0 : index
    %125 = vector.load %arg4[%124, %c0_31] : memref<4x32xf32, #tpu.memory_space<vmem>>, vector<1x32xf32>
    %126 = vector.broadcast %125 : vector<1x32xf32> to vector<8x32xf32>
    %127 = arith.addf %123, %126 : vector<8x32xf32>
    %128 = vector.broadcast %2 : vector<1x32xf32> to vector<8x32xf32>
    %129 = arith.mulf %127, %128 : vector<8x32xf32>
    %cst_32 = arith.constant dense<0.000000e+00> : vector<8xf32>
    %130 = vector.multi_reduction <add>, %129, %cst_32 [1] : vector<8x32xf32> to vector<8xf32>
    %131 = vector.shape_cast %130 : vector<8xf32> to vector<8x1xf32>
    %132 = vector.broadcast %3 : vector<1x1xf32> to vector<8x1xf32>
    %133 = arith.addf %131, %132 : vector<8x1xf32>
    %134 = arith.negf %133 : vector<8x1xf32>
    %135 = math.exp %134 : vector<8x1xf32>
    %cst_33 = arith.constant 1.000000e+00 : f32
    %136 = vector.broadcast %cst_33 : f32 to vector<8x1xf32>
    %137 = arith.addf %136, %135 : vector<8x1xf32>
    %138 = arith.divf %136, %137 : vector<8x1xf32>
    %cst_34 = arith.constant 1.000000e+00 : f32
    %139 = vector.broadcast %cst_34 : f32 to vector<8x1xf32>
    %140 = arith.cmpf olt, %105, %139 : vector<8x1xf32>
    %141 = arith.extui %140 : vector<8x1xi1> to vector<8x1xi32>
    %142 = arith.sitofp %141 : vector<8x1xi32> to vector<8x1xf32>
    %143 = arith.mulf %138, %142 : vector<8x1xf32>
    %144 = arith.addf %105, %143 : vector<8x1xf32>
    %cst_35 = arith.constant 0.899999976 : f32
    %145 = vector.broadcast %cst_35 : f32 to vector<8x1xf32>
    %146 = arith.cmpf ogt, %144, %145 : vector<8x1xf32>
    %147 = arith.extui %146 : vector<8x1xi1> to vector<8x1xi32>
    %148 = arith.sitofp %147 : vector<8x1xi32> to vector<8x1xf32>
    %149 = arith.mulf %148, %142 : vector<8x1xf32>
    %cst_36 = arith.constant 0.899999976 : f32
    %150 = vector.broadcast %cst_36 : f32 to vector<8x1xf32>
    %151 = arith.cmpf ole, %144, %150 : vector<8x1xf32>
    %152 = arith.extui %151 : vector<8x1xi1> to vector<8x1xi32>
    %153 = arith.sitofp %152 : vector<8x1xi32> to vector<8x1xf32>
    %154 = arith.mulf %153, %142 : vector<8x1xf32>
    %155 = arith.mulf %138, %154 : vector<8x1xf32>
    %156 = arith.addf %105, %155 : vector<8x1xf32>
    %cst_37 = arith.constant 1.000000e+00 : f32
    %157 = vector.broadcast %cst_37 : f32 to vector<8x1xf32>
    %158 = arith.subf %157, %156 : vector<8x1xf32>
    %159 = arith.mulf %149, %158 : vector<8x1xf32>
    %160 = arith.addf %103, %159 : vector<8x1xf32>
    %161 = arith.mulf %149, %160 : vector<8x1xf32>
    %162 = arith.addf %156, %161 : vector<8x1xf32>
    %163 = arith.addf %107, %154 : vector<8x1xf32>
    %164 = arith.addf %163, %149 : vector<8x1xf32>
    %165 = arith.mulf %138, %154 : vector<8x1xf32>
    %166 = arith.mulf %149, %160 : vector<8x1xf32>
    %167 = arith.addf %165, %166 : vector<8x1xf32>
    %168 = arith.truncf %127 : vector<8x32xf32> to vector<8x32xbf16>
    %cst_38 = arith.constant dense<0.000000e+00> : vector<8x32xf32>
    %169 = tpu.matmul %168, %1, %cst_38 {dimension_numbers = #tpu.dot_dimension_numbers<[1], [0], [0], [1], [0, 0, 1, 1], [], []>} : vector<8x32xbf16>, vector<32x32xbf16>, vector<8x32xf32> -> vector<8x32xf32>
    %170 = vector.broadcast %4 : vector<1x32xf32> to vector<8x32xf32>
    %171 = arith.addf %169, %170 : vector<8x32xf32>
    %172 = math.tanh %171 : vector<8x32xf32>
    %173 = vector.broadcast %167 : vector<8x1xf32> to vector<8x32xf32>
    %174 = arith.mulf %172, %173 : vector<8x32xf32>
    %cst_39 = arith.constant 1.000000e+00 : f32
    %175 = vector.broadcast %cst_39 : f32 to vector<8x1xf32>
    %176 = arith.subf %175, %167 : vector<8x1xf32>
    %177 = vector.broadcast %176 : vector<8x1xf32> to vector<8x32xf32>
    %178 = arith.mulf %122, %177 : vector<8x32xf32>
    %179 = arith.addf %174, %178 : vector<8x32xf32>
    %c3_i32 = arith.constant 3 : i32
    %180 = arith.addf %172, %0 : vector<8x32xf32>
    %181 = arith.index_cast %c3_i32 : i32 to index
    %c0_40 = arith.constant 0 : index
    %182 = vector.load %arg4[%181, %c0_40] : memref<4x32xf32, #tpu.memory_space<vmem>>, vector<1x32xf32>
    %183 = vector.broadcast %182 : vector<1x32xf32> to vector<8x32xf32>
    %184 = arith.addf %180, %183 : vector<8x32xf32>
    %185 = vector.broadcast %2 : vector<1x32xf32> to vector<8x32xf32>
    %186 = arith.mulf %184, %185 : vector<8x32xf32>
    %cst_41 = arith.constant dense<0.000000e+00> : vector<8xf32>
    %187 = vector.multi_reduction <add>, %186, %cst_41 [1] : vector<8x32xf32> to vector<8xf32>
    %188 = vector.shape_cast %187 : vector<8xf32> to vector<8x1xf32>
    %189 = vector.broadcast %3 : vector<1x1xf32> to vector<8x1xf32>
    %190 = arith.addf %188, %189 : vector<8x1xf32>
    %191 = arith.negf %190 : vector<8x1xf32>
    %192 = math.exp %191 : vector<8x1xf32>
    %cst_42 = arith.constant 1.000000e+00 : f32
    %193 = vector.broadcast %cst_42 : f32 to vector<8x1xf32>
    %194 = arith.addf %193, %192 : vector<8x1xf32>
    %195 = arith.divf %193, %194 : vector<8x1xf32>
    %cst_43 = arith.constant 1.000000e+00 : f32
    %196 = vector.broadcast %cst_43 : f32 to vector<8x1xf32>
    %197 = arith.cmpf olt, %162, %196 : vector<8x1xf32>
    %198 = arith.extui %197 : vector<8x1xi1> to vector<8x1xi32>
    %199 = arith.sitofp %198 : vector<8x1xi32> to vector<8x1xf32>
    %200 = arith.mulf %195, %199 : vector<8x1xf32>
    %201 = arith.addf %162, %200 : vector<8x1xf32>
    %cst_44 = arith.constant 0.899999976 : f32
    %202 = vector.broadcast %cst_44 : f32 to vector<8x1xf32>
    %203 = arith.cmpf ogt, %201, %202 : vector<8x1xf32>
    %204 = arith.extui %203 : vector<8x1xi1> to vector<8x1xi32>
    %205 = arith.sitofp %204 : vector<8x1xi32> to vector<8x1xf32>
    %206 = arith.mulf %205, %199 : vector<8x1xf32>
    %cst_45 = arith.constant 0.899999976 : f32
    %207 = vector.broadcast %cst_45 : f32 to vector<8x1xf32>
    %208 = arith.cmpf ole, %201, %207 : vector<8x1xf32>
    %209 = arith.extui %208 : vector<8x1xi1> to vector<8x1xi32>
    %210 = arith.sitofp %209 : vector<8x1xi32> to vector<8x1xf32>
    %211 = arith.mulf %210, %199 : vector<8x1xf32>
    %212 = arith.mulf %195, %211 : vector<8x1xf32>
    %213 = arith.addf %162, %212 : vector<8x1xf32>
    %cst_46 = arith.constant 1.000000e+00 : f32
    %214 = vector.broadcast %cst_46 : f32 to vector<8x1xf32>
    %215 = arith.subf %214, %213 : vector<8x1xf32>
    %216 = arith.mulf %206, %215 : vector<8x1xf32>
    %217 = arith.addf %160, %216 : vector<8x1xf32>
    %218 = arith.mulf %206, %217 : vector<8x1xf32>
    %219 = arith.addf %213, %218 : vector<8x1xf32>
    %220 = arith.addf %164, %211 : vector<8x1xf32>
    %221 = arith.addf %220, %206 : vector<8x1xf32>
    %222 = arith.mulf %195, %211 : vector<8x1xf32>
    %223 = arith.mulf %206, %217 : vector<8x1xf32>
    %224 = arith.addf %222, %223 : vector<8x1xf32>
    %225 = arith.truncf %184 : vector<8x32xf32> to vector<8x32xbf16>
    %cst_47 = arith.constant dense<0.000000e+00> : vector<8x32xf32>
    %226 = tpu.matmul %225, %1, %cst_47 {dimension_numbers = #tpu.dot_dimension_numbers<[1], [0], [0], [1], [0, 0, 1, 1], [], []>} : vector<8x32xbf16>, vector<32x32xbf16>, vector<8x32xf32> -> vector<8x32xf32>
    %227 = vector.broadcast %4 : vector<1x32xf32> to vector<8x32xf32>
    %228 = arith.addf %226, %227 : vector<8x32xf32>
    %229 = math.tanh %228 : vector<8x32xf32>
    %230 = vector.broadcast %224 : vector<8x1xf32> to vector<8x32xf32>
    %231 = arith.mulf %229, %230 : vector<8x32xf32>
    %cst_48 = arith.constant 1.000000e+00 : f32
    %232 = vector.broadcast %cst_48 : f32 to vector<8x1xf32>
    %233 = arith.subf %232, %224 : vector<8x1xf32>
    %234 = vector.broadcast %233 : vector<8x1xf32> to vector<8x32xf32>
    %235 = arith.mulf %179, %234 : vector<8x32xf32>
    %236 = arith.addf %231, %235 : vector<8x32xf32>
    %c4_i32 = arith.constant 4 : i32
    %c0_49 = arith.constant 0 : index
    %c0_50 = arith.constant 0 : index
    %c0_51 = arith.constant 0 : index
    %237 = vector.load %arg9[%c0_49, %c0_50, %c0_51] : memref<1x8x32xf32, #tpu.memory_space<vmem>>, vector<1x8x32xf32>
    %238 = vector.shape_cast %237 : vector<1x8x32xf32> to vector<8x32xf32>
    %239 = vector.shape_cast %236 : vector<8x32xf32> to vector<1x8x32xf32>
    tpu.vector_store %arg9[%c0_49, %c0_50, %c0_51], %239 {strides = array<i32>} : memref<1x8x32xf32, #tpu.memory_space<vmem>>, vector<1x8x32xf32>,
    %c0_52 = arith.constant 0 : index
    %c0_53 = arith.constant 0 : index
    %c0_54 = arith.constant 0 : index
    %240 = vector.load %arg10[%c0_52, %c0_53, %c0_54] : memref<1x8x1xf32, #tpu.memory_space<vmem>>, vector<1x8x1xf32>
    %241 = vector.shape_cast %240 : vector<1x8x1xf32> to vector<8x1xf32>
    %242 = vector.shape_cast %217 : vector<8x1xf32> to vector<1x8x1xf32>
    tpu.vector_store %arg10[%c0_52, %c0_53, %c0_54], %242 {strides = array<i32>} : memref<1x8x1xf32, #tpu.memory_space<vmem>>, vector<1x8x1xf32>,
    %c0_55 = arith.constant 0 : index
    %c0_56 = arith.constant 0 : index
    %c0_57 = arith.constant 0 : index
    %243 = vector.load %arg11[%c0_55, %c0_56, %c0_57] : memref<1x8x1xf32, #tpu.memory_space<vmem>>, vector<1x8x1xf32>
    %244 = vector.shape_cast %243 : vector<1x8x1xf32> to vector<8x1xf32>
    %245 = vector.shape_cast %221 : vector<8x1xf32> to vector<1x8x1xf32>
    tpu.vector_store %arg11[%c0_55, %c0_56, %c0_57], %245 {strides = array<i32>} : memref<1x8x1xf32, #tpu.memory_space<vmem>>, vector<1x8x1xf32>,
    return
  }
  func.func @transform_0(%arg0: i32, %arg1: i32) -> (i32, i32, i32) {
    %c0_i32 = arith.constant 0 : i32
    %c0_i32_0 = arith.constant 0 : i32
    return %arg0, %arg1, %c0_i32 : i32, i32, i32
  }
  func.func @transform_1(%arg0: i32, %arg1: i32) -> (i32, i32) {
    %c0_i32 = arith.constant 0 : i32
    %c0_i32_0 = arith.constant 0 : i32
    return %arg1, %c0_i32 : i32, i32
  }
  func.func @transform_2(%arg0: i32, %arg1: i32) -> (i32, i32) {
    %c0_i32 = arith.constant 0 : i32
    %c0_i32_0 = arith.constant 0 : i32
    %c0_i32_1 = arith.constant 0 : i32
    return %c0_i32, %c0_i32_0 : i32, i32
  }
  func.func @transform_3(%arg0: i32, %arg1: i32) -> (i32, i32) {
    %c0_i32 = arith.constant 0 : i32
    %c0_i32_0 = arith.constant 0 : i32
    %c0_i32_1 = arith.constant 0 : i32
    return %c0_i32, %c0_i32_0 : i32, i32
  }
  func.func @transform_4(%arg0: i32, %arg1: i32) -> (i32, i32) {
    %c0_i32 = arith.constant 0 : i32
    %c0_i32_0 = arith.constant 0 : i32
    %c0_i32_1 = arith.constant 0 : i32
    return %c0_i32, %c0_i32_0 : i32, i32
  }
  func.func @transform_5(%arg0: i32, %arg1: i32) -> (i32, i32) {
    %c0_i32 = arith.constant 0 : i32
    %c0_i32_0 = arith.constant 0 : i32
    %c0_i32_1 = arith.constant 0 : i32
    return %c0_i32, %c0_i32_0 : i32, i32
  }
  func.func @transform_6(%arg0: i32, %arg1: i32) -> (i32, i32) {
    %c0_i32 = arith.constant 0 : i32
    %c0_i32_0 = arith.constant 0 : i32
    %c0_i32_1 = arith.constant 0 : i32
    return %c0_i32, %c0_i32_0 : i32, i32
  }
  func.func @transform_7(%arg0: i32, %arg1: i32) -> (i32, i32, i32) {
    %c0_i32 = arith.constant 0 : i32
    %c0_i32_0 = arith.constant 0 : i32
    return %arg0, %arg1, %c0_i32 : i32, i32, i32
  }
  func.func @transform_8(%arg0: i32, %arg1: i32) -> (i32, i32, i32) {
    %c0_i32 = arith.constant 0 : i32
    %c0_i32_0 = arith.constant 0 : i32
    return %arg0, %arg1, %c0_i32 : i32, i32, i32
  }
  func.func @transform_9(%arg0: i32, %arg1: i32) -> (i32, i32, i32) {
    %c0_i32 = arith.constant 0 : i32
    %c0_i32_0 = arith.constant 0 : i32
    return %arg0, %arg1, %c0_i32 : i32, i32, i32
  }
}

</mosaic_0001>

<bundles_post_ra>
// kernel: tpu_custom_call.1
= control target key start
LH: loop header
LB: loop body
LE: loop exit
PB: predicated region body
PF: predicated region fallthrough
CT: control target
= control target key end

     0   :  { %s1798_s0 = inlined_call_operand.hbm [shape: f32[2,8,32], index: 0, kind: input, shape index: {}]   ;;  %s1799_s1 = inlined_call_operand.hbm [shape: f32[8,32], index: 1, kind: input, shape index: {}]   ;;  %s1800_s2 = inlined_call_operand.vmem [shape: f32[4,32], index: 2, kind: input, shape index: {}]   ;;  %s1801_s3 = inlined_call_operand.vmem [shape: f32[1,32], index: 3, kind: input, shape index: {}]   ;;  %s1802_s4 = inlined_call_operand.<no memory space> [shape: f32[1,1], index: 4, kind: input, shape index: {}]   ;;  %s1803_s5 = inlined_call_operand.hbm [shape: bf16[32,32], index: 5, kind: input, shape index: {}]   ;;  %s1804_s6 = inlined_call_operand.vmem [shape: f32[1,32], index: 6, kind: input, shape index: {}]   ;;  %s1805_s7 = inlined_call_operand.hbm [shape: f32[2,8,32], index: 7, kind: output, shape index: {0}]   ;;  %s1806_s8 = inlined_call_operand.vmem [shape: f32[2,8,1], index: 8, kind: output, shape index: {1}]   ;;  %s1807_s9 = inlined_call_operand.vmem [shape: f32[2,8,1], index: 9, kind: output, shape index: {2}]  }
   0x1   :  { %1814 = sst [smem:[#allocation15_spill]] %s1799_s1  ;;  %v15_v0 = vstv %s1802_s4 }
   0x2   :  { %1815 = sst [smem:[#allocation16_spill]] %s1803_s5  ;;  %16 = vst [vmem:[#allocation2] sm:$0x1] %v15_v0 }
   0x3   :  { %17 = vsyncpa [#allocation4], 0 }
   0x4   :  { %19 = vsyncpa [#allocation4 + $0x1], 0 }
   0x5   :  { %20 = vsyncpa [#allocation7], 0 }
   0x6   :  { %21 = vsyncpa [#allocation5], 0 }
   0x7   :  { %23 = vsyncpa [#allocation5 + $0x1], 0  ;;  %s1515_s11 = smov 0   ;;  %s1517_s12 = smov 0  }
   0x8   :  { %s1519_s13 = smov 0   ;;  %s1521_s14 = smov 0  }
   0x9   :  { %s1523_s15 = smov 0   ;;  %s1525_s16 = smov 0  }
   0xa LB: > { %1816 = sst [smem:[#allocation13_spill]] %s1447_s15  ;;  %s1080_s4 = sadd.s32 4294967295, %s1451_s16   ;;  %s1451_s16 = sphi %s1525_s16, %s29_s16   ;;  %s1447_s15 = sphi %s1523_s15, %s1835_s15   ;;  %s1443_s14 = sphi %s1521_s14, %s1834_s14   ;;  %s1439_s13 = sphi %s1519_s13, %s1838_s13   ;;  %s1435_s12 = sphi %s1517_s12, %s1837_s12   ;;  %s1431_s11 = sphi %s1515_s11, %s1836_s11  }
   0xb   : > { %s1081_s17 = sadd.s32 4294967294, %s1451_s16   ;;  %p63_p0 = scmp.ne.s32.totalorder %s1435_s12, %s1431_s11 }
   0xc   : > { %p1549_p1 = scmp.eq.s32.totalorder %s1080_s4, 0  ;;  %p1553_p2 = scmp.eq.s32.totalorder %s1080_s4, 1 }
   0xd   : > { %p226_p3 = scmp.eq.s32.totalorder %s1081_s17, 1  ;;  %p1082_p5 = scmp.ge.s32.totalorder %s1451_s16, 1 }
   0xe   : > { %s1817_s18 = scalar_select %p1549_p1, 1, 0 }
   0xf   : > { %s1818_s19 = scalar_select %p1553_p2, 1, 0 }
  0x10   : > { %p1559_p4 = por %p1549_p1, %p63_p0  ;;  %p1564_p6 = por %p226_p3, %p63_p0 }
  0x11   : > { %p289_p7 = scmp.lt.s32.totalorder %s1451_s16, 3  ;;  %s1453_s23 = smov [#allocation6]  }
  0x12   : > { %s1819_s20 = scalar_select %p1559_p4, 1, 0 }
  0x13   : > { %s1820_s21 = scalar_select %p1564_p6, 1, 0 }
  0x14   : > { %p1569_p8 = pnand %p1082_p5, %p289_p7  ;;  %s304_s24 = sshll.u32 %s1453_s23, 4  ;;  %s305_s24 = int_to_ptr.vmem [resolvable:$true] %s304_s24 }
  0x15   : > { %s1454_s25 = smov [#allocation8]   ;;  %s1298_s28 = scalar_lea.vmem %s305_s24, 128 }
  0x16   : > { %s1821_s22 = scalar_select %p1569_p8, 1, 0 }
  0x17   : > { %p1183_p10 = pneg %p1569_p8  ;;  %s323_s26 = sshll.u32 %s1454_s25, 4  ;;  %s324_s26 = int_to_ptr.vmem [resolvable:$true] %s323_s26 }
  0x18   : > { %p1299_p13 = scmp.ne.s32.totalorder %s305_s24, %s1298_s28  ;;  %p1306_p5 = scmp.lt.s32.totalorder %s305_s24, %s305_s24 }
  0x19   : > { %p1578_p11 = pnand %p1183_p10, %p1549_p1  ;;  %p1307_p7 = scmp.lt.s32.totalorder %s1298_s28, %s1298_s28 }
  0x1b   : > { %p1289_p12 = pneg %p1578_p11  ;;  %p1308_p9 = por %p1307_p7, %p1306_p5 }
  0x1d   : > { %p1301_p0 = pnand %p1299_p13, %p1289_p12 }
  0x1f   : > { %p1302_p3 = pneg %p1301_p0 }
  0x21   : > { %p1309_p6 = pnand %p1308_p9, %p1302_p3 }
  0x23   : > { %1312 = shalt.err (!%p1309_p6)
}
  0x24   : > { %s1823_s1 = sld [smem:[#allocation15_spill]]  ;;  %s1324_s10 = scalar_lea.vmem %s324_s26, 256 }
  0x25   : > { %p1325_p10 = scmp.ne.s32.totalorder %s324_s26, %s1324_s10  ;;  %p1332_p13 = scmp.lt.s32.totalorder %s324_s26, %s324_s26 }
  0x26   : > { %p1333_p0 = scmp.lt.s32.totalorder %s1324_s10, %s1324_s10 }
  0x27   : > { %p1327_p1 = pnand %p1325_p10, %p1289_p12 }
  0x28   : > { %p1334_p8 = por %p1333_p0, %p1332_p13 }
  0x29   : > { %p1328_p4 = pneg %p1327_p1 }
  0x2a   : > { %1186 = dma.hbm_to_vmem [thread:$0]  (!%p1578_p11), %s1823_s1, 128, %s305_s24, [#allocation7]  }
  0x2b   : > { %p1335_p2 = pnand %p1334_p8, %p1328_p4 }
  0x2d   : > { %1338 = shalt.err (!%p1335_p2)
}
  0x2e   : > { %s1455_s4 = smov 64   ;;  %s1456_s17 = smov 4  }
  0x2f   : > { %s1824_s5 = sld [smem:[#allocation16_spill]]  ;;  %s41_s25 = sadd.s32 1, %s1447_s15 }
  0x30   : > { %s50_s28 = sadd.s32 1, %s1439_s13  ;;  %p43_p1 = scmp.ge.s32.totalorder %s41_s25, 2 }
  0x31   : > { %p57_p2 = scmp.ne.s32.totalorder %s1439_s13, %s1435_s12  ;;  %p58_p4 = scmp.eq.s32.totalorder %s1451_s16, 0 }
  0x32   : > { %p1200_p6 = scmp.lt.s32.totalorder %s1451_s16, 2  ;;  %s1840_s25 = smov (%p43_p1, %s41_s25), 0 }
  0x33   : > { %1825 = sst [smem:[#allocation14_spill]] %s1840_s25  ;;  %p59_p8 = por %p58_p4, %p57_p2 }
  0x34   : > { %p1826_p9 = scmp.ne.s32.totalorder %s1818_s19, 0  ;;  %s45_s27 = ssub.s32 %s1447_s15, %s1840_s25 }
  0x35   : > { %1189 = dma.hbm_to_vmem [thread:$0]  (!%p1578_p11), %s1824_s5, 256, %s324_s26, [#allocation7], %s1455_s4, %s1455_s4, %s1456_s17  }
  0x36   : > { %p1610_p12 = por %p1826_p9, %p57_p2  ;;  %s340_s30 = sand.u32 1, %s1439_s13  }
  0x37   : > { %p48_p3 = scmp.eq.s32.totalorder %s45_s27, 0  ;;  %s1086_s26 = sshll.u32 %s340_s30, 3 }
  0x38   : > { %s1087_s10 = sshll.u32 %s1447_s15, 7  ;;  %s344_s1 = scalar_lea.vmem [#allocation3], %s1086_s26 }
  0x39   : > { %s1619_s4 = scalar_select %p48_p3, %s1439_s13, %s50_s28  }
  0x3a   : > { %s350_s24 = scalar_lea.hbm %s1798_s0, %s1087_s10  ;;  %s352_s5 = sshll.u32 %s344_s1, 4  ;;  %s353_s5 = int_to_ptr.vmem [resolvable:$true] %s352_s5 }
  0x3b   : > { %p1626_p11 = pnand %p1200_p6, %p59_p8  ;;  %s341_s25 = scalar_lea.sflag [#allocation4], %s340_s30 }
  0x3c   : > { %s1352_s27 = scalar_lea.vmem %s353_s5, 128  ;;  %s1457_s28 = smov [#allocation3]  }
  0x3d   : > { %p1341_p5 = pneg %p1626_p11  ;;  %p1353_p7 = scmp.ne.s32.totalorder %s353_s5, %s1352_s27 }
  0x3e   : > { %s1357_s15 = sshll.u32 %s1457_s28, 4  ;;  %s1358_s15 = int_to_ptr.vmem [resolvable:$false] %s1357_s15 }
  0x3f   : > { %p1355_p10 = pnand %p1353_p7, %p1341_p5  ;;  %s1359_s10 = scalar_lea.vmem %s1358_s15, 256 }
  0x40   : > { %p1360_p0 = scmp.lt.s32.totalorder %s353_s5, %s1358_s15  ;;  %p1361_p1 = scmp.lt.s32.totalorder %s1359_s10, %s1352_s27 }
  0x41   : > { %p1356_p13 = pneg %p1355_p10 }
  0x42   : > { %p1362_p2 = por %p1361_p1, %p1360_p0 }
  0x44   : > { %p1363_p4 = pnand %p1362_p2, %p1356_p13 }
  0x46   : > { %1366 = shalt.err (!%p1363_p4)
}
  0x47   : > { %1193 = dma.hbm_to_vmem [thread:$0]  (!%p1626_p11), %s350_s24, 128, %s353_s5, %s341_s25  }
  0x48   : > { %p1829_p6 = scmp.ne.s32.totalorder %s1821_s22, 0 }
  0x49   : > { %s1637_s1 = sand.u32 (!%p1829_p6), 1, %s1435_s12   ;;  %p1830_p8 = scmp.ne.s32.totalorder (!%p1829_p6), %s1819_s20, 0 }
  0x4a   : > { %361 = sbr.rel (%p1829_p6) target bundleno = 1078 (0x436), region = 48  ;;  %s1089_s30 = sshll.u32 (!%p1829_p6), %s1637_s1, 3 }
  0x4b   : > { %s364_s26 = scalar_lea.sflag (!%p1829_p6), [#allocation4], %s1637_s1  ;;  %s367_s15 = scalar_lea.vmem (!%p1829_p6), [#allocation3], %s1089_s30 }
  0x4f   : > { %1418 = dma.done.wait (%p1830_p8), %s364_s26, 128  }
  0x50   : > { %1420 = vsyncadd (%p1830_p8), %s364_s26, 4294967168  ;;  %p1831_p9 = scmp.ne.s32.totalorder %s1817_s18, 0 }
  0x52   : > { %1422 = dma.done.wait (%p1831_p9), [#allocation7], 384  }
  0x53   : > { %1424 = vsyncadd (%p1831_p9), [#allocation7], 4294966912  ;;  %v1458_v1 = vmov 0.0   ;;  %vm1459_vm0 = vmmov 0   ;;  %v1261_v2 = vld [vmem:[#allocation8 + $0x8] sm:$0xff]   ;;  %v1262_v3 = vld [vmem:[#allocation8] sm:$0xff]  }
  0x54   : > { %1139 = vmatprep.subr.bf16.mxu0 %v1458_v1  ;;  %1143 = vmatprep.mubr.msk.bf16.mxu0 %vm1459_vm0, %v1458_v1  ;;  %v1657_v4 = vld [vmem:[#allocation6] sm:$0xff]  ;;  %v447_v5 = vld [vmem:[%s367_s15] sm:$0xff]  ;;  %v1095_v6 = vld [vmem:[%s1800_s2] ss:$0 sm:$0xff]  ;;  %vm462_vm1 = vcmask 261120   ;;  %v1460_v13 = vmov 0  }
  0x55   : > { %1147 = vmatprep.subr.bf16.mxu1 %v1458_v1  ;;  %1151 = vmatprep.mubr.msk.bf16.mxu1 %vm1459_vm0, %v1458_v1  ;;  %v448_v7 = vadd.f32 %v447_v5, %v1657_v4  ;;  %v1668_v8 = vld [vmem:[%s1801_s3] ss:$0 sm:$0xff]  ;;  %v1105_v27 = vld [vmem:[%s1800_s2 + $0x1] ss:$0 sm:$0xff]  ;;  %v1111_v63 = vld [vmem:[%s1800_s2 + $0x2] ss:$0 sm:$0xff] }
  0x56   : > { %1140 = vmatpush3.bf16.msra.mxu0 %v1261_v2  ;;  %1148 = vmatpush3.bf16.msra.mxu1 %v1261_v2  ;;  %v1678_v14 = vld [vmem:[#allocation2] ss:$0 sm:$0xff]  ;;  %p424_p3 = scmp.lt.s32.totalorder %s1443_s14, 1  ;;  %vm879_vm13 = vcmask 7168   ;;  %s1124_s23 = sshll.u32 %s1443_s14, 7 }
  0x57   : > { %1141 = vmatprep.subr.bf16.mxu0 %v1458_v1  ;;  %1149 = vmatprep.subr.bf16.mxu1 %v1458_v1  ;;  %v454_v9 = vadd.f32 %v1095_v6, %v448_v7  ;;  %v1684_v19 = vld [vmem:[%s1804_s6] ss:$0 sm:$0xff]  ;;  %s405_s24 = scalar_lea.vmem [#allocation9], %s1089_s30  ;;  %s909_s10 = scalar_lea.hbm %s1805_s7, %s1124_s23 }
  0x58   : > { %1259 = vset.pattern.permute.xlu0 %v1460_v13  ;;  %1260 = vset.pattern.permute.xlu1 %v1460_v13  ;;  %s425_s26 = scalar_select %p424_p3, %s1443_s14, 1 }
  0x59   : > { %v502_v10 = vpack.c.bf16 %v454_v9, %v454_v9  ;;  %v461_v11 = vmul.f32 %v1668_v8, %v454_v9  ;;  %s911_s19 = sshll.u32 %s405_s24, 4  ;;  %s1461_s14 = smov [#allocation9]   ;;  %s912_s19 = int_to_ptr.vmem [resolvable:$true] %s911_s19 }
  0x5a   : > { %1142 = vmatpush3.bf16.msra.mxu0 %v1262_v3  ;;  %1150 = vmatpush3.bf16.msra.mxu1 %v1262_v3  ;;  %s1093_s15 = sshll.u32 %s425_s26, 3  ;;  %s883_s26 = scalar_lea.sflag [#allocation5], %s1637_s1 }
  0x5b   : > { %1155 = vmatprep.subr.bf16.mxu0 %v1458_v1  ;;  %1163 = vmatprep.subr.bf16.mxu1 %v1458_v1  ;;  %v463_v12 = vsel %vm462_vm1, %v461_v11, 0.0  ;;  %s437_s20 = scalar_lea.vmem %s1807_s9, %s1093_s15  ;;  %s430_s17 = scalar_lea.vmem %s1806_s8, %s1093_s15 }
  0x5c   : > { %464 = vadd.xlane.f32.xlu0 %v463_v12  ;;  %s1367_s15 = scalar_lea.vmem %s912_s19, 128  ;;  %s1371_s5 = sshll.u32 %s1461_s14, 4  ;;  %s1372_s5 = int_to_ptr.vmem [resolvable:$false] %s1371_s5 }
  0x5d   : > { %1144 = vmatmul.mubr.msk.bf16.vlgmr.msra.gmra.mxu0 %vm462_vm1, %v502_v10  ;;  %p1368_p11 = scmp.ne.s32.totalorder %s912_s19, %s1367_s15  ;;  %s1373_s30 = scalar_lea.vmem %s1372_s5, 256 }
  0x5e   : > { %1156 = vmatpush3.bf16.msra.mxu0 %v1261_v2  ;;  %1159 = vmatprep.mubr.msk.bf16.mxu0 %vm1459_vm0, %v1458_v1  ;;  %p1374_p10 = scmp.lt.s32.totalorder %s912_s19, %s1372_s5  ;;  %p1375_p13 = scmp.lt.s32.totalorder %s1373_s30, %s1367_s15 }
  0x5f   : > { %1157 = vmatprep.subr.bf16.mxu0 %v1458_v1  ;;  %p1369_p5 = pnand %p1368_p11, %p1610_p12 }
  0x60   : > { %p1376_p0 = por %p1375_p13, %p1374_p10 }
  0x61   : > { %p1370_p7 = pneg %p1369_p5 }
  0x62   : > { %1158 = vmatpush3.bf16.msra.mxu0 %v1262_v3 }
  0x63   : > { %p1377_p1 = pnand %p1376_p0, %p1370_p7 }
  0xe5   : > { %v465_v15 = vpop.xlane.xlu0 %464 }
  0xe6   : > { %v472_v16 = vadd.f32 %v1678_v14, %v465_v15 }
  0xe8   : > { %v1098_v17 = vmul.f32 -1.442695, %v472_v16 }
  0xea   : > { %1263 = vpow2.f32 %v1098_v17 }
  0xf7   : > { %v1264_v18 = vpop.eup %1263 }
  0xf8   : > { %v476_v20 = vadd.f32 1.0, %v1264_v18 }
 0x11d   : > { %v558_v21 = vpop.f32.mrf.mxu0 }
 0x11e   : > { %v559_v22 = vadd.f32 %v1684_v19, %v558_v21 }
 0x11f   : > { %v1145_v23 = vpop.f32.mrf.mxu0 }
 0x120   : > { %1265 = vtanh.f32 %v559_v22 }
 0x121   : > { %1267 = vrcp.f32 %v476_v20  ;;  %v561_v24 = vpop.f32.mrf.mxu0 }
 0x123   : > { %v1146_v25 = vpop.f32.mrf.mxu0 }
 0x12d   : > { %v1687_v26 = vpop.eup %1265 }
 0x12e   : > { %v1268_v28 = vpop.eup %1267  ;;  %v579_v29 = vadd.f32 %v1687_v26, %v1657_v4 }
 0x12f   : > { %vm488_vm2 = vcmp.le.f32.partialorder %v1268_v28, 0.9  ;;  %vm484_vm3 = vcmp.gt.f32.partialorder %v1268_v28, 0.9 }
 0x130   : > { %v585_v30 = vadd.f32 %v1105_v27, %v579_v29  ;;  %v1100_v34 = vsel %vm488_vm2, 1.0, %v1458_v1  ;;  %v1099_v37 = vsel %vm484_vm3, 1.0, %v1458_v1 }
 0x131   : > { %v492_v35 = vmul.f32 %v1268_v28, %v1100_v34  ;;  %v500_v50 = vadd.f32 %v1100_v34, %v1099_v37 }
 0x132   : > { %v620_v31 = vpack.c.bf16 %v585_v30, %v585_v30  ;;  %v586_v32 = vmul.f32 %v1668_v8, %v585_v30 }
 0x133   : > { %v494_v36 = vsub.f32 1.0, %v492_v35 }
 0x134   : > { %1152 = vmatmul.mubr.msk.bf16.vlgmr.msra.gmra.mxu1 %vm462_vm1, %v620_v31  ;;  %v587_v33 = vsel %vm462_vm1, %v586_v32, 0.0 }
 0x135   : > { %588 = vadd.xlane.f32.xlu0 %v587_v33  ;;  %1164 = vmatpush3.bf16.msra.mxu1 %v1261_v2  ;;  %v495_v38 = vmul.f32 %v1099_v37, %v494_v36 }
 0x136   : > { %1165 = vmatprep.subr.bf16.mxu1 %v1458_v1  ;;  %1167 = vmatprep.mubr.msk.bf16.mxu1 %vm1459_vm0, %v1458_v1 }
 0x137   : > { %v497_v39 = vmul.f32 %v1099_v37, %v495_v38 }
 0x139   : > { %1166 = vmatpush3.bf16.msra.mxu1 %v1262_v3  ;;  %v1702_v40 = vadd.f32 %v497_v39, %v492_v35 }
 0x13b   : > { %vm597_vm4 = vcmp.lt.f32.partialorder %v1702_v40, 1.0 }
 0x13c   : > { %v1107_v46 = vsel %vm597_vm4, 1.0, %v1458_v1 }
 0x14b   : > { %567 = vperm.xlu0 %1259, %v1702_v40  }
 0x1be   : > { %v589_v41 = vpop.xlane.xlu0 %588 }
 0x1bf   : > { %v590_v42 = vadd.f32 %v1678_v14, %v589_v41 }
 0x1c1   : > { %v1106_v43 = vmul.f32 -1.442695, %v590_v42 }
 0x1c3   : > { %1269 = vpow2.f32 %v1106_v43 }
 0x1d0   : > { %v1270_v44 = vpop.eup %1269 }
 0x1d1   : > { %v594_v45 = vadd.f32 1.0, %v1270_v44 }
 0x1d3   : > { %1271 = vrcp.f32 %v594_v45 }
 0x1e0   : > { %v1272_v47 = vpop.eup %1271 }
 0x1e1   : > { %v600_v48 = vmul.f32 %v1272_v47, %v1107_v46 }
 0x1e3   : > { %v601_v49 = vadd.f32 %v600_v48, %v1702_v40 }
 0x1e5   : > { %vm602_vm5 = vcmp.gt.f32.partialorder %v601_v49, 0.9  ;;  %vm606_vm6 = vcmp.le.f32.partialorder %v601_v49, 0.9 }
 0x1e6   : > { %v1108_v51 = vsel %vm602_vm5, 1.0, %v1458_v1  ;;  %v1109_v52 = vsel %vm606_vm6, 1.0, %v1458_v1 }
 0x1e7   : > { %v609_v53 = vmul.f32 %v1109_v52, %v1107_v46  ;;  %v605_v54 = vmul.f32 %v1108_v51, %v1107_v46 }
 0x1e9   : > { %v617_v55 = vadd.f32 %v609_v53, %v500_v50  ;;  %v610_v11 = vmul.f32 %v1272_v47, %v609_v53  ;;  %v1117_v47 = vld [vmem:[%s1800_s2 + $0x3] ss:$0 sm:$0xff]  ;;  %v571_v53 = vsub.f32 1.0, %v1702_v40 }
 0x1eb   : > { %v618_v56 = vadd.f32 %v617_v55, %v605_v54  ;;  %v611_v12 = vadd.f32 %v610_v11, %v1702_v40 }
 0x1ed   : > { %v612_v13 = vsub.f32 1.0, %v611_v12 }
 0x1ef   : > { %v613_v15 = vmul.f32 %v612_v13, %v605_v54 }
 0x1f1   : > { %v614_v18 = vadd.f32 %v613_v15, %v495_v38 }
 0x1f3   : > { %v615_v20 = vmul.f32 %v614_v18, %v605_v54 }
 0x1f4   : > { %v658_v57 = vpop.f32.mrf.mxu1 }
 0x1f5   : > { %v659_v58 = vadd.f32 %v1684_v19, %v658_v57  ;;  %v616_v21 = vadd.f32 %v615_v20, %v611_v12  ;;  %v619_v54 = vadd.f32 %v615_v20, %v610_v11 }
 0x1f6   : > { %v1153_v59 = vpop.f32.mrf.mxu1 }
 0x1f7   : > { %1273 = vtanh.f32 %v659_v58  ;;  %vm697_vm7 = vcmp.lt.f32.partialorder %v616_v21, 1.0  ;;  %v671_v55 = vsub.f32 1.0, %v619_v54 }
 0x1f8   : > { %v661_v60 = vpop.f32.mrf.mxu1  ;;  %v1113_v23 = vsel %vm697_vm7, 1.0, %v1458_v1 }
 0x1fa   : > { %v1154_v61 = vpop.f32.mrf.mxu1 }
 0x204   : > { %v1712_v62 = vpop.eup %1273 }
 0x205   : > { %v679_v0 = vadd.f32 %v1712_v62, %v1657_v4 }
 0x207   : > { %v685_v2 = vadd.f32 %v1111_v63, %v679_v0 }
 0x209   : > { %v720_v3 = vpack.c.bf16 %v685_v2, %v685_v2  ;;  %v686_v5 = vmul.f32 %v1668_v8, %v685_v2 }
 0x20b   : > { %1160 = vmatmul.mubr.msk.bf16.vlgmr.msra.gmra.mxu0 %vm462_vm1, %v720_v3  ;;  %v687_v6 = vsel %vm462_vm1, %v686_v5, 0.0 }
 0x20c   : > { %688 = vadd.xlane.f32.xlu1 %v687_v6 }
 0x295   : > { %v689_v7 = vpop.xlane.xlu1 %688 }
 0x296   : > { %v690_v9 = vadd.f32 %v1678_v14, %v689_v7 }
 0x298   : > { %v1112_v10 = vmul.f32 -1.442695, %v690_v9 }
 0x29a   : > { %1275 = vpow2.f32 %v1112_v10 }
 0x2a7   : > { %v1276_v16 = vpop.eup %1275 }
 0x2a8   : > { %v694_v17 = vadd.f32 1.0, %v1276_v16 }
 0x2aa   : > { %1277 = vrcp.f32 %v694_v17 }
 0x2b7   : > { %v1278_v22 = vpop.eup %1277 }
 0x2b8   : > { %v700_v24 = vmul.f32 %v1278_v22, %v1113_v23 }
 0x2ba   : > { %v701_v25 = vadd.f32 %v700_v24, %v616_v21 }
 0x2bc   : > { %vm702_vm8 = vcmp.gt.f32.partialorder %v701_v25, 0.9  ;;  %vm706_vm9 = vcmp.le.f32.partialorder %v701_v25, 0.9  ;;  %v568_v25 = vpop.permute.xlu0 %567 }
 0x2bd   : > { %v1114_v27 = vsel %vm702_vm8, 1.0, %v1458_v1  ;;  %v1115_v28 = vsel %vm706_vm9, 1.0, %v1458_v1 }
 0x2be   : > { %v709_v29 = vmul.f32 %v1115_v28, %v1113_v23  ;;  %v705_v30 = vmul.f32 %v1114_v27, %v1113_v23 }
 0x2c0   : > { %v710_v31 = vmul.f32 %v1278_v22, %v709_v29  ;;  %v717_v32 = vadd.f32 %v709_v29, %v618_v56  ;;  %v570_v29 = vmul.f32 %v1687_v26, %v568_v25 }
 0x2c2   : > { %v711_v33 = vadd.f32 %v710_v31, %v616_v21  ;;  %v718_v34 = vadd.f32 %v717_v32, %v705_v30 }
 0x2c4   : > { %v712_v35 = vsub.f32 1.0, %v711_v33 }
 0x2c6   : > { %v713_v36 = vmul.f32 %v712_v35, %v705_v30 }
 0x2c8   : > { %v714_v37 = vadd.f32 %v713_v36, %v614_v18 }
 0x2ca   : > { %v715_v38 = vmul.f32 %v714_v37, %v705_v30 }
 0x2cb   : > { %v758_v39 = vpop.f32.mrf.mxu0 }
 0x2cc   : > { %v759_v41 = vadd.f32 %v1684_v19, %v758_v39  ;;  %v716_v42 = vadd.f32 %v715_v38, %v711_v33  ;;  %v719_v56 = vadd.f32 %v715_v38, %v710_v31 }
 0x2cd   : > { %v1161_v43 = vpop.f32.mrf.mxu0 }
 0x2ce   : > { %1279 = vtanh.f32 %v759_v41  ;;  %vm797_vm10 = vcmp.lt.f32.partialorder %v716_v42, 1.0 }
 0x2cf   : > { %v761_v44 = vpop.f32.mrf.mxu0  ;;  %v1119_v61 = vsel %vm797_vm10, 1.0, %v1458_v1 }
 0x2d1   : > { %v1162_v45 = vpop.f32.mrf.mxu0 }
 0x2db   : > { %v1728_v46 = vpop.eup %1279 }
 0x2dc   : > { %v779_v48 = vadd.f32 %v1728_v46, %v1657_v4  ;;  %v771_v4 = vsub.f32 1.0, %v719_v56 }
 0x2de   : > { %v785_v49 = vadd.f32 %v1117_v47, %v779_v48 }
 0x2e0   : > { %v819_v50 = vpack.c.bf16 %v785_v49, %v785_v49  ;;  %v786_v51 = vmul.f32 %v1668_v8, %v785_v49 }
 0x2e2   : > { %1168 = vmatmul.mubr.msk.bf16.vlgmr.msra.gmra.mxu1 %vm462_vm1, %v819_v50  ;;  %v787_v52 = vsel %vm462_vm1, %v786_v51, 0.0 }
 0x2e3   : > { %788 = vadd.xlane.f32.xlu1 %v787_v52 }
 0x2f4   : > { %574 = vperm.xlu1 %1260, %v571_v53  }
 0x2f8   : > { %667 = vperm.xlu1 %1260, %v619_v54  }
 0x2fc   : > { %674 = vperm.xlu1 %1260, %v671_v55  }
 0x300   : > { %767 = vperm.xlu1 %1260, %v719_v56  }
 0x304   : > { %774 = vperm.xlu1 %1260, %v771_v4  }
 0x36c   : > { %v789_v57 = vpop.xlane.xlu1 %788 }
 0x36d   : > { %v790_v8 = vadd.f32 %v1678_v14, %v789_v57 }
 0x36f   : > { %v1118_v58 = vmul.f32 -1.442695, %v790_v8 }
 0x370   : > { %v575_v22 = vpop.permute.xlu1 %574 }
 0x371   : > { %1281 = vpow2.f32 %v1118_v58  ;;  %v577_v27 = vmul.f32 0.0, %v575_v22 }
 0x373   : > { %v578_v31 = vadd.f32 %v577_v27, %v570_v29 }
 0x374   : > { %v668_v23 = vpop.permute.xlu1 %667 }
 0x375   : > { %v670_v33 = vmul.f32 %v1712_v62, %v668_v23 }
 0x378   : > { %v675_v24 = vpop.permute.xlu1 %674 }
 0x379   : > { %v677_v32 = vmul.f32 %v675_v24, %v578_v31 }
 0x37b   : > { %v678_v35 = vadd.f32 %v677_v32, %v670_v33 }
 0x37c   : > { %v768_v30 = vpop.permute.xlu1 %767 }
 0x37d   : > { %v770_v38 = vmul.f32 %v1728_v46, %v768_v30 }
 0x37e   : > { %v1282_v59 = vpop.eup %1281 }
 0x37f   : > { %v794_v60 = vadd.f32 1.0, %v1282_v59 }
 0x381   : > { %1283 = vrcp.f32 %v794_v60 }
 0x38e   : > { %v1284_v40 = vpop.eup %1283 }
 0x38f   : > { %v800_v63 = vmul.f32 %v1284_v40, %v1119_v61 }
 0x391   : > { %v801_v0 = vadd.f32 %v800_v63, %v716_v42 }
 0x393   : > { %vm802_vm11 = vcmp.gt.f32.partialorder %v801_v0, 0.9  ;;  %vm806_vm12 = vcmp.le.f32.partialorder %v801_v0, 0.9 }
 0x394   : > { %v1120_v2 = vsel %vm802_vm11, 1.0, %v1458_v1  ;;  %v1121_v3 = vsel %vm806_vm12, 1.0, %v1458_v1 }
 0x395   : > { %v809_v14 = vmul.f32 %v1121_v3, %v1119_v61  ;;  %v805_v5 = vmul.f32 %v1120_v2, %v1119_v61 }
 0x397   : > { %v810_v6 = vmul.f32 %v1284_v40, %v809_v14  ;;  %v815_v7 = vadd.f32 %v809_v14, %v718_v34  ;;  %v775_v34 = vpop.permute.xlu1 %774 }
 0x398   : > { %v777_v36 = vmul.f32 %v775_v34, %v678_v35 }
 0x399   : > { %v811_v9 = vadd.f32 %v810_v6, %v716_v42  ;;  %v816_v10 = vadd.f32 %v815_v7, %v805_v5 }
 0x39a   : > { %v778_v39 = vadd.f32 %v777_v36, %v770_v38 }
 0x39b   : > { %v812_v11 = vsub.f32 1.0, %v811_v9  ;;  %881 = vst.msk [vmem:[%s437_s20] sm:$0xff] %vm879_vm13, %v816_v10 }
 0x39d   : > { %v813_v12 = vmul.f32 %v812_v11, %v805_v5 }
 0x39f   : > { %v814_v1 = vadd.f32 %v813_v12, %v714_v37 }
 0x3a1   : > { %v817_v13 = vmul.f32 %v814_v1, %v805_v5  ;;  %880 = vst.msk [vmem:[%s430_s17] sm:$0xff] %vm879_vm13, %v814_v1 }
 0x3a2   : > { %v857_v15 = vpop.f32.mrf.mxu1 }
 0x3a3   : > { %v818_v16 = vadd.f32 %v817_v13, %v810_v6  ;;  %v858_v28 = vadd.f32 %v1684_v19, %v857_v15 }
 0x3a4   : > { %v1169_v17 = vpop.f32.mrf.mxu1 }
 0x3a5   : > { %866 = vperm.xlu1 %1260, %v818_v16   ;;  %v870_v20 = vsub.f32 1.0, %v818_v16  ;;  %1285 = vtanh.f32 %v858_v28 }
 0x3a6   : > { %v860_v18 = vpop.f32.mrf.mxu1 }
 0x3a8   : > { %v1170_v21 = vpop.f32.mrf.mxu1 }
 0x3a9   : > { %873 = vperm.xlu1 %1260, %v870_v20  }
 0x3b2   : > { %v1286_v41 = vpop.eup %1285 }
 0x420   : > { %v867_v37 = vpop.permute.xlu1 %866 }
 0x421   : > { %v869_v26 = vmul.f32 %v1286_v41, %v867_v37 }
 0x424   : > { %v874_v19 = vpop.permute.xlu1 %873 }
 0x425   : > { %v876_v42 = vmul.f32 %v874_v19, %v778_v39 }
 0x427   : > { %v877_v43 = vadd.f32 %v876_v42, %v869_v26 }
 0x429   : > { %878 = vst.msk [vmem:[%s405_s24] sm:$0xff] %vm462_vm1, %v877_v43 }
 0x42a   : > { %1380 = shalt.err (!%p1377_p1)
}
 0x42b   : > { %s1381_s18 = scalar_lea.hbm %s909_s10, 128  ;;  %s1385_s22 = scalar_lea.hbm %s1805_s7, 256 }
 0x42c   : > { %p1382_p2 = scmp.ne.s32.totalorder %s909_s10, %s1381_s18  ;;  %p1386_p8 = scmp.lt.s32.totalorder %s909_s10, %s1805_s7 }
 0x42d   : > { %p1387_p9 = scmp.lt.s32.totalorder %s1385_s22, %s1381_s18 }
 0x42e   : > { %p1383_p4 = pnand %p1382_p2, %p1610_p12 }
 0x42f   : > { %p1388_p3 = por %p1387_p9, %p1386_p8 }
 0x430   : > { %p1384_p6 = pneg %p1383_p4 }
 0x432   : > { %p1389_p11 = pnand %p1388_p3, %p1384_p6 }
 0x434   : > { %1392 = shalt.err (!%p1389_p11)
}
 0x435   : > { %1181 = dma.vmem_to_hbm [thread:$0]  (%p1610_p12), %s912_s19, 128, %s909_s10, %s883_s26  }
 0x436 PF: > { %s929_s23 = sand.u32 1, %s1431_s11   ;;  %p1832_p5 = scmp.ne.s32.totalorder %s1820_s21, 0 }
 0x437   : > { %p1833_p7 = scmp.ge.s32.totalorder %s1451_s16, 2  ;;  %s930_s24 = scalar_lea.sflag [#allocation5], %s929_s23 }
 0x439   : > { %p1195_p10 = pnand %p1833_p7, %p1832_p5 }
 0x43b   : > { %p1196_p13 = pneg %p1195_p10 }
 0x43d   : > { %1426 = dma.done.wait (%p1196_p13), %s930_s24, 128  }
 0x43e   : > { %1428 = vsyncadd (%p1196_p13), %s930_s24, 4294967168  ;;  %s29_s16 = sadd.s32 1, %s1451_s16   ;;  %s1834_s14 = sld [smem:[#allocation13_spill]] }
 0x43f   : > { %p26_p0 = scmp.ge.s32.totalorder %s29_s16, 4   ;;  %s1835_s15 = sld [smem:[#allocation14_spill]] }
 0x440   : > { %s1836_s11 = smov %s1435_s12  ;;  %s1837_s12 = smov %s1439_s13 }
 0x441   : > { %s1838_s13 = smov %s1619_s4  ;;  %28 = sbr.rel (!%p26_p0) target bundleno = 10 (0xa), region = 126 }
 0x446   :  { %955 = vsyncpa [#allocation4], 1 }
 0x447   :  { %957 = vsyncpa [#allocation4 + $0x1], 1 }
 0x448   :  { %958 = vsyncpa [#allocation7], 1 }
 0x449   :  { %959 = vsyncpa [#allocation5], 1 }
 0x44a   :  { %961 = vsyncpa [#allocation5 + $0x1], 1 }

</bundles_post_ra>
